<compile_context>
chip_gen: v7x
topology: tpu7x:2x2x1
jax: 0.10.0
libtpu: 0.0.40
codegen_flags: <defaults>
</compile_context>

<pallas_src>
import numpy as np
import jax
import jax.numpy as jnp
from jax.experimental import pallas as pl
from jax.experimental.pallas import tpu as pltpu

P = 128        # lane-dense padded feature width for hidden activations/weights
TB_MAX = 1024  # batch-tile cap (review: 512 was over-conservative)


def _round_up(v, m):
    return ((v + m - 1) // m) * m


# ----------------------------- mask construction -----------------------------
def build_made_masks(nin, hidden_sizes, nout, natural_ordering=True, seed=0):
    """Replicates MADE.update_masks() (numpy). masks[i]: (in, out) of layer i."""
    L = len(hidden_sizes)
    rng = np.random.RandomState(seed)
    m = {}
    m[-1] = np.arange(nin) if natural_ordering else rng.permutation(nin)
    for l in range(L):
        m[l] = rng.randint(m[l - 1].min(), nin - 1, size=hidden_sizes[l])
    masks = [m[l - 1][:, None] <= m[l][None, :] for l in range(L)]
    masks.append(m[L - 1][:, None] < m[-1][None, :])
    if nout > nin:
        k = int(nout / nin)
        masks[-1] = np.concatenate([masks[-1]] * k, axis=1)
    return [msk.astype(np.float32) for msk in masks]


# ------------------------------ parameter setup -------------------------------
def init_made_params(key, nin, hidden_sizes, nout, bias=True):
    """Deterministic init mimicking nn.Linear: W (out,in), b (out,)."""
    hs = [nin] + list(hidden_sizes) + [nout]
    params = []
    for h0, h1 in zip(hs, hs[1:]):
        key, kw, kb = jax.random.split(key, 3)
        bound = 1.0 / np.sqrt(h0)
        w = jax.random.uniform(kw, (h1, h0), jnp.float32, -bound, bound)
        b = (jax.random.uniform(kb, (h1,), jnp.float32, -bound, bound)
             if bias else jnp.zeros((h1,), jnp.float32))
        params.append((np.asarray(w), np.asarray(b)))
    return params


def pack_params(params, masks):
    """Mask, transpose to (in,out), zero-pad to (P,P), stack into one
    (n_layers, P, P) bf16 weight slab + (n_layers, P) f32 bias slab."""
    n_layers = len(params)
    w_packed = np.zeros((n_layers, P, P), np.float32)
    b_packed = np.zeros((n_layers, P), np.float32)
    for idx, (w, b) in enumerate(params):
        h1, h0 = w.shape                      # (out, in)
        assert h0 <= P and h1 <= P
        w_io = (w * masks[idx].T).T           # (in, out) -> y = x @ W
        w_packed[idx, :h0, :h1] = w_io
        b_packed[idx, :h1] = b
    return (jnp.asarray(w_packed, jnp.bfloat16),
            jnp.asarray(b_packed, jnp.float32))


# ------------------------------- Pallas kernel --------------------------------
def made_mlp_kernel(x_ref, w_ref, b_ref, out_ref):
    """Fused masked MLP on one batch tile.

    x_ref  : (TB, nin)  f32   true-width input (no wrapper pad)
    w_ref  : (L, P, P)  bf16  masked, (in,out)-oriented, zero-padded weights
                              (constant index_map -> resident in VMEM)
    b_ref  : (L, P)     f32   zero-padded biases (explicit VPU add)
    out_ref: (TB, nout) f32   true-width output
    """
    nin = x_ref.shape[1]
    nout = out_ref.shape[1]
    n_layers = w_ref.shape[0]

    b = b_ref[...]                                      # (L, P) f32

    x = x_ref[...].astype(jnp.bfloat16)                 # in-kernel cast (free)
    # Layer 0: only the first `nin` weight rows are meaningful (K = nin).
    h = jnp.dot(x, w_ref[0, :nin, :],
                preferred_element_type=jnp.float32) + b[0:1, :]
    for l in range(1, n_layers):                        # static unroll
        h = jnp.maximum(h, 0.0).astype(jnp.bfloat16)    # f32 ReLU, bf16 for MXU
        h = jnp.dot(h, w_ref[l],
                    preferred_element_type=jnp.float32) + b[l:l + 1, :]
    out_ref[...] = h[:, :nout]                          # narrow true-width store


def made_forward_pallas(x, w_packed, b_packed, nout, tb_max=TB_MAX):
    """x: (B, nin) f32. w_packed: (L,P,P) bf16. b_packed: (L,P) f32.
    Returns (B, nout) f32."""
    B, nin = x.shape
    n_layers = w_packed.shape[0]

    # Batch tile: multiple of 16 (bf16 sublane packing), capped at tb_max,
    # chosen so at least 2 tiles cover B when possible.
    TB = min(tb_max, _round_up(max(pl.cdiv(B, 2), 16), 16))
    # Grid even and >= 2 so both v7x TensorCores get work (no-op cost on
    # v5e/v6e beyond one zero-filled tile).
    grid_b = _round_up(max(2, pl.cdiv(B, TB)), 2)
    Bp = grid_b * TB

    x_in = x if Bp == B else jnp.pad(x, ((0, Bp - B), (0, 0)))

    flops = 2 * Bp * (nin * P + (n_layers - 1) * P * P)
    bytes_accessed = (Bp * nin * 4            # true-width f32 input
                      + int(w_packed.size) * 2
                      + int(b_packed.size) * 4
                      + Bp * nout * 4)        # true-width f32 output

    out_p = pl.pallas_call(
        made_mlp_kernel,
        out_shape=jax.ShapeDtypeStruct((Bp, nout), jnp.float32),
        grid=(grid_b,),
        in_specs=[
            pl.BlockSpec((TB, nin), lambda i: (i, 0)),             # activations
            pl.BlockSpec((n_layers, P, P), lambda i: (0, 0, 0)),   # resident W
            pl.BlockSpec((n_layers, P), lambda i: (0, 0)),         # resident b
        ],
        out_specs=pl.BlockSpec((TB, nout), lambda i: (i, 0)),
        compiler_params=pltpu.CompilerParams(
            dimension_semantics=("parallel",)),
        cost_estimate=pl.CostEstimate(
            flops=flops, transcendentals=0, bytes_accessed=bytes_accessed),
    )(x_in, w_packed, b_packed)

    return out_p if Bp == B else out_p[:B]


# ------------------------------- references -----------------------------------
def reference_bf16(x, w_packed, b_packed, nout):
    """Mirrors the kernel numerics (bf16 operands, f32 acc, f32 bias/ReLU)."""
    nin = x.shape[1]
    n_layers = w_packed.shape[0]
    h = jnp.dot(x.astype(jnp.bfloat16), w_packed[0, :nin, :],
                preferred_element_type=jnp.float32) + b_packed[0][None, :]
    for l in range(1, n_layers):
        h = jnp.maximum(h, 0.0).astype(jnp.bfloat16)
        h = jnp.dot(h, w_packed[l],
                    preferred_element_type=jnp.float32) + b_packed[l][None, :]
    return h[:, :nout]


def reference_f32(x, params, masks):
    """True unpadded f32 math of the PyTorch module (structure check)."""
    h = x
    n = len(params)
    for idx, (w, b) in enumerate(params):
        wm = jnp.asarray(w * masks[idx].T)              # (out, in)
        h = h @ wm.T + jnp.asarray(b)[None, :]
        if idx < n - 1:
            h = jnp.maximum(h, 0.0)
    return h


# ----------------------------------- main -------------------------------------
if __name__ == "__main__":
    # MADE config consistent with the module's constructor.
    nin = 16
    hidden_sizes = [32, 32]
    num_dist_parameters = 2
    num_mix = 1
    nout = nin * (num_dist_parameters if num_mix == 1
                  else 1 + num_dist_parameters) * num_mix   # = 32
    assert nout % nin == 0

    batch = 8

    masks = build_made_masks(nin, hidden_sizes, nout,
                             natural_ordering=True, seed=0)

    key = jax.random.PRNGKey(0)
    key, kx = jax.random.split(key)
    x = jax.random.normal(kx, (batch, nin), jnp.float32)

    params = init_made_params(key, nin, hidden_sizes, nout, bias=True)
    w_packed, b_packed = pack_params(params, masks)

    out = made_forward_pallas(x, w_packed, b_packed, nout)
    out = jax.block_until_ready(out)
    assert out.shape == (batch, nout) and out.dtype == jnp.float32

    # Exact-numerics reference (same bf16/f32-acc path as the kernel).
    ref_b = reference_bf16(x, w_packed, b_packed, nout)
    np.testing.assert_allclose(np.asarray(out), np.asarray(ref_b),
                               rtol=1e-2, atol=1e-2)

    # Structural reference: unpadded, un-packed f32 math (loose tol for bf16).
    ref_f = reference_f32(x, params, masks)
    np.testing.assert_allclose(np.asarray(out), np.asarray(ref_f),
                               rtol=1e-1, atol=1e-1)

    print("KERNEL_OK")
</pallas_src>

<mosaic_0001>
module attributes {stable_mosaic.version = 11 : i64} {
  func.func @made_mlp_kernel(%arg0: i32, %arg1: memref<16x16xf32, #tpu.memory_space<vmem>>, %arg2: memref<3x128x128xbf16, #tpu.memory_space<vmem>>, %arg3: memref<3x128xf32, #tpu.memory_space<vmem>>, %arg4: memref<16x32xf32, #tpu.memory_space<vmem>>) attributes {dimension_semantics = [#tpu.dimension_semantics<parallel>], iteration_bounds = array<i64: 2>, scalar_prefetch = 0 : i64, scratch_operands = 0 : i64, tpu.core_type = #tpu.core_type<tc>, window_params = [{transform_indices = @transform_0, window_bounds = array<i64: 16, 16>}, {pipeline_mode = #tpu.pipeline_mode<synchronous>, transform_indices = @transform_1, window_bounds = array<i64: 3, 128, 128>}, {pipeline_mode = #tpu.pipeline_mode<synchronous>, transform_indices = @transform_2, window_bounds = array<i64: 3, 128>}, {transform_indices = @transform_3, window_bounds = array<i64: 16, 32>}]} {
    %c0 = arith.constant 0 : index
    %c0_0 = arith.constant 0 : index
    %0 = vector.load %arg3[%c0, %c0_0] : memref<3x128xf32, #tpu.memory_space<vmem>>, vector<3x128xf32>
    %c0_1 = arith.constant 0 : index
    %c0_2 = arith.constant 0 : index
    %1 = vector.load %arg1[%c0_1, %c0_2] : memref<16x16xf32, #tpu.memory_space<vmem>>, vector<16x16xf32>
    %2 = arith.truncf %1 : vector<16x16xf32> to vector<16x16xbf16>
    %c0_3 = arith.constant 0 : index
    %c0_4 = arith.constant 0 : index
    %c0_5 = arith.constant 0 : index
    %3 = vector.load %arg2[%c0_3, %c0_4, %c0_5] : memref<3x128x128xbf16, #tpu.memory_space<vmem>>, vector<1x16x128xbf16>
    %4 = vector.shape_cast %3 : vector<1x16x128xbf16> to vector<16x128xbf16>
    %cst = arith.constant dense<0.000000e+00> : vector<16x128xf32>
    %5 = tpu.matmul %2, %4, %cst {dimension_numbers = #tpu.dot_dimension_numbers<[1], [0], [0], [1], [0, 0, 1, 1], [], []>} : vector<16x16xbf16>, vector<16x128xbf16>, vector<16x128xf32> -> vector<16x128xf32>
    %6 = vector.extract_strided_slice %0 {offsets = [0, 0], sizes = [1, 128], strides = [1, 1]} : vector<3x128xf32> to vector<1x128xf32>
    %7 = vector.broadcast %6 : vector<1x128xf32> to vector<16x128xf32>
    %8 = arith.addf %5, %7 : vector<16x128xf32>
    %cst_6 = arith.constant 0.000000e+00 : f32
    %9 = vector.broadcast %cst_6 : f32 to vector<16x128xf32>
    %10 = arith.maximumf %8, %9 : vector<16x128xf32>
    %11 = arith.truncf %10 : vector<16x128xf32> to vector<16x128xbf16>
    %c1 = arith.constant 1 : index
    %c0_7 = arith.constant 0 : index
    %c0_8 = arith.constant 0 : index
    %12 = vector.load %arg2[%c1, %c0_7, %c0_8] : memref<3x128x128xbf16, #tpu.memory_space<vmem>>, vector<1x128x128xbf16>
    %13 = vector.shape_cast %12 : vector<1x128x128xbf16> to vector<128x128xbf16>
    %cst_9 = arith.constant dense<0.000000e+00> : vector<16x128xf32>
    %14 = tpu.matmul %11, %13, %cst_9 {dimension_numbers = #tpu.dot_dimension_numbers<[1], [0], [0], [1], [0, 0, 1, 1], [], []>} : vector<16x128xbf16>, vector<128x128xbf16>, vector<16x128xf32> -> vector<16x128xf32>
    %15 = vector.extract_strided_slice %0 {offsets = [1, 0], sizes = [1, 128], strides = [1, 1]} : vector<3x128xf32> to vector<1x128xf32>
    %16 = vector.broadcast %15 : vector<1x128xf32> to vector<16x128xf32>
    %17 = arith.addf %14, %16 : vector<16x128xf32>
    %cst_10 = arith.constant 0.000000e+00 : f32
    %18 = vector.broadcast %cst_10 : f32 to vector<16x128xf32>
    %19 = arith.maximumf %17, %18 : vector<16x128xf32>
    %20 = arith.truncf %19 : vector<16x128xf32> to vector<16x128xbf16>
    %c2 = arith.constant 2 : index
    %c0_11 = arith.constant 0 : index
    %c0_12 = arith.constant 0 : index
    %21 = vector.load %arg2[%c2, %c0_11, %c0_12] : memref<3x128x128xbf16, #tpu.memory_space<vmem>>, vector<1x128x128xbf16>
    %22 = vector.shape_cast %21 : vector<1x128x128xbf16> to vector<128x128xbf16>
    %cst_13 = arith.constant dense<0.000000e+00> : vector<16x128xf32>
    %23 = tpu.matmul %20, %22, %cst_13 {dimension_numbers = #tpu.dot_dimension_numbers<[1], [0], [0], [1], [0, 0, 1, 1], [], []>} : vector<16x128xbf16>, vector<128x128xbf16>, vector<16x128xf32> -> vector<16x128xf32>
    %24 = vector.extract_strided_slice %0 {offsets = [2, 0], sizes = [1, 128], strides = [1, 1]} : vector<3x128xf32> to vector<1x128xf32>
    %25 = vector.broadcast %24 : vector<1x128xf32> to vector<16x128xf32>
    %26 = arith.addf %23, %25 : vector<16x128xf32>
    %27 = vector.extract_strided_slice %26 {offsets = [0, 0], sizes = [16, 32], strides = [1, 1]} : vector<16x128xf32> to vector<16x32xf32>
    %c0_14 = arith.constant 0 : index
    %c0_15 = arith.constant 0 : index
    %28 = vector.load %arg4[%c0_14, %c0_15] : memref<16x32xf32, #tpu.memory_space<vmem>>, vector<16x32xf32>
    tpu.vector_store %arg4[%c0_14, %c0_15], %27 {strides = array<i32>} : memref<16x32xf32, #tpu.memory_space<vmem>>, vector<16x32xf32>,
    return
  }
  func.func @transform_0(%arg0: i32) -> (i32, i32) {
    %c0_i32 = arith.constant 0 : i32
    %c0_i32_0 = arith.constant 0 : i32
    return %arg0, %c0_i32 : i32, i32
  }
  func.func @transform_1(%arg0: i32) -> (i32, i32, i32) {
    %c0_i32 = arith.constant 0 : i32
    %c0_i32_0 = arith.constant 0 : i32
    %c0_i32_1 = arith.constant 0 : i32
    %c0_i32_2 = arith.constant 0 : i32
    return %c0_i32, %c0_i32_0, %c0_i32_1 : i32, i32, i32
  }
  func.func @transform_2(%arg0: i32) -> (i32, i32) {
    %c0_i32 = arith.constant 0 : i32
    %c0_i32_0 = arith.constant 0 : i32
    %c0_i32_1 = arith.constant 0 : i32
    return %c0_i32, %c0_i32_0 : i32, i32
  }
  func.func @transform_3(%arg0: i32) -> (i32, i32) {
    %c0_i32 = arith.constant 0 : i32
    %c0_i32_0 = arith.constant 0 : i32
    return %arg0, %c0_i32 : i32, i32
  }
}

</mosaic_0001>

<bundles_post_ra>
// kernel: tpu_custom_call.1
= control target key start
LH: loop header
LB: loop body
LE: loop exit
PB: predicated region body
PF: predicated region fallthrough
CT: control target
= control target key end

     0   :  { %8 = vsyncpa [#allocation3], 0  ;;  %s1025_s0 = inlined_call_operand.vmem [shape: f32[32,16], index: 0, kind: input, shape index: {}]   ;;  %s1026_s1 = inlined_call_operand.hbm [shape: bf16[3,128,128], index: 1, kind: input, shape index: {}]   ;;  %s1027_s2 = inlined_call_operand.vmem [shape: f32[3,128], index: 2, kind: input, shape index: {}]   ;;  %s1028_s3 = inlined_call_operand.hbm [shape: f32[32,32], index: 3, kind: output, shape index: {}]  }
   0x1   :  { %9 = vsyncpa [#allocation4], 0 }
   0x2   :  { %11 = vsyncpa [#allocation4 + $0x1], 0  ;;  %s862_s12 = smov 0   ;;  %s864_s13 = smov 0  }
   0x3   :  { %s866_s14 = smov 0   ;;  %s868_s15 = smov 0  }
   0x4 LB: > { %s883_s16 = sadd.s32 4294967295, %s832_s15   ;;  %s566_s17 = sadd.s32 4294967294, %s832_s15   ;;  %s832_s15 = sphi %s868_s15, %s1044_s15   ;;  %s828_s14 = sphi %s866_s14, %s1043_s14   ;;  %s824_s13 = sphi %s864_s13, %s1042_s13   ;;  %s820_s12 = sphi %s862_s12, %s1041_s12  }
   0x5   : > { %s887_s18 = sadd.s32 1, %s832_s15   ;;  %s92_s19 = sadd.s32 1, %s828_s14 }
   0x6   : > { %s89_s20 = ssub.s32 %s832_s15, %s887_s18  ;;  %p102_p0 = scmp.ne.s32.totalorder %s828_s14, %s824_s13 }
   0x7   : > { %p90_p1 = scmp.eq.s32.totalorder %s89_s20, 0  ;;  %p103_p2 = scmp.eq.s32.totalorder %s883_s16, 1 }
   0x8   : > { %p108_p3 = scmp.ne.s32.totalorder %s824_s13, %s820_s12  ;;  %p109_p4 = scmp.eq.s32.totalorder %s566_s17, 1 }
   0x9   : > { %s898_s21 = scalar_select %p90_p1, %s828_s14, %s92_s19  }
   0xa   : > { %p900_p5 = por %p103_p2, %p102_p0  ;;  %p904_p6 = por %p109_p4, %p108_p3 }
   0xb   : > { %p567_p7 = scmp.ge.s32.totalorder %s832_s15, 1  ;;  %p116_p8 = scmp.lt.s32.totalorder %s832_s15, 3 }
   0xc   : > { %s1032_s22 = scalar_select %p900_p5, 1, 0 }
   0xd   : > { %s1033_s23 = scalar_select %p904_p6, 1, 0 }
   0xe   : > { %p1029_p9 = scmp.eq.s32.totalorder %s883_s16, 0  ;;  %p911_p10 = pnand %p567_p7, %p116_p8 }
   0xf   : > { %s834_s25 = smov [#allocation2]   ;;  %s738_s30 = scalar_lea.hbm %s1026_s1, 3072 }
  0x10   : > { %s1034_s24 = scalar_select %p911_p10, 1, 0 }
  0x11   : > { %s128_s26 = sshll.u32 %s834_s25, 4  ;;  %p671_p11 = pneg %p911_p10  ;;  %s129_s26 = int_to_ptr.vmem [resolvable:$true] %s128_s26 }
  0x12   : > { %p739_p13 = scmp.ne.s32.totalorder %s1026_s1, %s738_s30  ;;  %p745_p3 = scmp.lt.u32.totalorder %s738_s30, %s1026_s1 }
  0x13   : > { %p919_p12 = pnand %p1029_p9, %p671_p11 }
  0x15   : > { %p740_p0 = pneg %p919_p12 }
  0x17   : > { %p741_p1 = pnand %p740_p0, %p739_p13 }
  0x19   : > { %p742_p2 = pneg %p741_p1 }
  0x1b   : > { %p747_p4 = pnand %p745_p3, %p742_p2 }
  0x1d   : > { %750 = shalt.err (!%p747_p4)
}
  0x1e   : > { %s751_s8 = scalar_lea.vmem %s129_s26, 3072  ;;  %p759_p9 = scmp.lt.s32.totalorder %s129_s26, %s129_s26 }
  0x1f   : > { %p752_p7 = scmp.ne.s32.totalorder %s129_s26, %s751_s8  ;;  %p760_p6 = scmp.lt.s32.totalorder %s751_s8, %s751_s8 }
  0x21   : > { %p754_p8 = pnand %p752_p7, %p740_p0  ;;  %p761_p5 = por %p760_p6, %p759_p9 }
  0x23   : > { %p755_p11 = pneg %p754_p8 }
  0x25   : > { %p762_p10 = pnand %p761_p5, %p755_p11 }
  0x27   : > { %765 = shalt.err (!%p762_p10)
}
  0x28   : > { %s835_s9 = smov 64   ;;  %s836_s10 = smov 4  }
  0x29   : > { %674 = dma.hbm_to_vmem [thread:$0]  (!%p919_p12), %s1026_s1, 3072, %s129_s26, [#allocation3], %s835_s9, %s835_s9, %s836_s10  }
  0x2a   : > { %p1036_p13 = scmp.ne.s32.totalorder %s1034_s24, 0 }
  0x2b   : > { %p1037_p1 = scmp.eq.s32.totalorder (!%p1036_p13), %s883_s16, 0 }
  0x2c   : > { %156 = sbr.rel (%p1036_p13) target bundleno = 732 (0x2dc), region = 32 }
  0x33   : > { %811 = dma.done.wait (%p1037_p1), [#allocation3], 3072   ;;  %p1038_p0 = pmov %p1037_p1 }
  0x34   : > { %s573_s19 = sshll.u32 %s883_s16, 1  ;;  %v837_v0 = vmov 0.0   ;;  %vm838_vm0 = vmmov 0   ;;  %v721_v1 = vld [vmem:[#allocation2] sm:$0xff]   ;;  %vm204_vm1 = vcmask 130048   ;;  %v723_v6 = vld [vmem:[#allocation2 + $0x48] sm:$0xff]   ;;  %v194_v19 = vlaneseq }
  0x35   : > { %813 = vsyncadd (%p1038_p0), [#allocation3], 4294964224  ;;  %619 = vmatprep.subr.bf16.mxu0 %v837_v0  ;;  %621 = vmatprep.mubr.msk.bf16.mxu0 %vm838_vm0, %v837_v0  ;;  %p181_p5 = scmp.lt.s32.totalorder %s573_s19, 3  ;;  %v722_v5 = vld [vmem:[#allocation2 + $0x40] sm:$0xff]   ;;  %v724_v7 = vld [vmem:[#allocation2 + $0x50] sm:$0xff]   ;;  %s177_s29 = sand.u32 1, %s824_s13  }
  0x36   : > { %625 = vmatprep.subr.bf16.mxu1 %v837_v0  ;;  %641 = vmatprep.mubr.msk.bf16.mxu1 %vm838_vm0, %v837_v0  ;;  %v725_v8 = vld [vmem:[#allocation2 + $0x58] sm:$0xff]   ;;  %v726_v9 = vld [vmem:[#allocation2 + $0x60] sm:$0xff]   ;;  %v727_v10 = vld [vmem:[#allocation2 + $0x68] sm:$0xff]   ;;  %v195_v20 = vshrl.u32 %v194_v19, 7  ;;  %s572_s30 = sshll.u32 %s177_s29, 4  ;;  %s598_s6 = sshll.u32 %s883_s16, 8 }
  0x37   : > { %s1046_s19 = smov (!%p181_p5, %s573_s19), 3  ;;  %620 = vmatpush3.bf16.msra.mxu0 %v721_v1  ;;  %626 = vmatpush3.bf16.msra.mxu1 %v722_v5  ;;  %v728_v11 = vld [vmem:[#allocation2 + $0x70] sm:$0xff]   ;;  %v729_v12 = vld [vmem:[#allocation2 + $0x78] sm:$0xff]   ;;  %v730_v13 = vld [vmem:[#allocation2 + $0x80] sm:$0xff]   ;;  %s179_s4 = scalar_lea.vmem [#allocation5], %s572_s30  ;;  %vm475_vm2 = vcmask 261120  }
  0x38   : > { %s574_s20 = sshll.u32 %s1046_s19, 3  ;;  %645 = vmatprep.subr.bf16.mxu0 %v837_v0  ;;  %627 = vmatprep.subr.bf16.mxu1 %v837_v0  ;;  %v731_v14 = vld [vmem:[#allocation2 + $0x88] sm:$0xff]   ;;  %v732_v15 = vld [vmem:[#allocation2 + $0x90] sm:$0xff]   ;;  %v733_v16 = vld [vmem:[#allocation2 + $0x98] sm:$0xff]   ;;  %v196_v21 = vsub.s32 0, %v195_v20  ;;  %v271_v35 = vsub.s32 1, %v195_v20  ;;  %s982_s9 = scalar_lea.hbm %s1028_s3, %s598_s6 }
  0x39   : > { %s184_s26 = scalar_lea.vmem %s1025_s0, %s574_s20  ;;  %v734_v17 = vld [vmem:[#allocation2 + $0xa0] sm:$0xff]   ;;  %v735_v18 = vld [vmem:[#allocation2 + $0xa8] sm:$0xff]   ;;  %v736_v33 = vld [vmem:[#allocation2 + $0xb0] sm:$0xff]   ;;  %v384_v46 = vsub.s32 2, %v195_v20  ;;  %s492_s5 = sshll.u32 %s179_s4, 4  ;;  %s977_s5 = int_to_ptr.vmem [resolvable:$true] %s492_s5 }
  0x3a   : > { %v189_v2 = vld [vmem:[%s184_s26] sm:$0xff]  ;;  %v190_v3 = vld [vmem:[%s184_s26 + $0x8] sm:$0xff]  ;;  %v737_v34 = vld [vmem:[#allocation2 + $0xb8] sm:$0xff]   ;;  %s984_s16 = scalar_lea.sflag [#allocation4], %s177_s29  ;;  %s766_s10 = scalar_lea.vmem %s977_s5, 256 }
  0x3b   : > { %v191_v4 = vpack.c.bf16 %v190_v3, %v189_v2  ;;  %628 = vmatpush3.bf16.msra.mxu1 %v723_v6  ;;  %v188_v22 = vld [vmem:[%s1027_s2] sm:$0x7]  ;;  %p767_p6 = scmp.ne.s32.totalorder %s977_s5, %s766_s10  ;;  %p1039_p9 = scmp.ne.s32.totalorder %s1032_s22, 0 }
  0x3c   : > { %629 = vmatprep.subr.bf16.mxu1 %v837_v0  ;;  %v197_v23 = vrot.slane %v188_v22, %v196_v21  ;;  %v272_v36 = vrot.slane %v188_v22, %v271_v35  ;;  %v385_v47 = vrot.slane %v188_v22, %v384_v46  ;;  %s839_s11 = smov [#allocation5]  }
  0x3d   : > { %622 = vmatmul.mubr.msk.bf16.vlgmr.msra.gmra.mrb[0].mxu0 %vm204_vm1, %v191_v4  ;;  %p768_p10 = pnand %p767_p6, %p1039_p9  ;;  %s770_s17 = sshll.u32 %s839_s11, 4  ;;  %s771_s17 = int_to_ptr.vmem [resolvable:$false] %s770_s17 }
  0x3e   : > { %661 = vmatprep.mubr.msk.bf16.mxu0 %vm838_vm0, %v837_v0  ;;  %646 = vmatpush3.bf16.msra.mxu0 %v730_v13  ;;  %s772_s19 = scalar_lea.vmem %s771_s17, 512  ;;  %p773_p2 = scmp.lt.s32.totalorder %s977_s5, %s771_s17 }
  0x3f   : > { %630 = vmatpush3.bf16.msra.mxu1 %v724_v7  ;;  %647 = vmatprep.subr.bf16.mxu0 %v837_v0  ;;  %p769_p12 = pneg %p768_p10  ;;  %p774_p3 = scmp.lt.s32.totalorder %s772_s19, %s766_s10 }
  0x40   : > { %631 = vmatprep.subr.bf16.mxu1 %v837_v0 }
  0x41   : > { %p775_p4 = por %p774_p3, %p773_p2 }
  0x42   : > { %648 = vmatpush3.bf16.msra.mxu0 %v731_v14 }
  0x43   : > { %632 = vmatpush3.bf16.msra.mxu1 %v725_v8  ;;  %649 = vmatprep.subr.bf16.mxu0 %v837_v0  ;;  %p776_p7 = pnand %p775_p4, %p769_p12 }
  0x44   : > { %633 = vmatprep.subr.bf16.mxu1 %v837_v0 }
  0x46   : > { %650 = vmatpush3.bf16.msra.mxu0 %v732_v15 }
  0x47   : > { %634 = vmatpush3.bf16.msra.mxu1 %v726_v9  ;;  %651 = vmatprep.subr.bf16.mxu0 %v837_v0 }
  0x48   : > { %635 = vmatprep.subr.bf16.mxu1 %v837_v0 }
  0x4a   : > { %652 = vmatpush3.bf16.msra.mxu0 %v733_v16 }
  0x4b   : > { %636 = vmatpush3.bf16.msra.mxu1 %v727_v10  ;;  %653 = vmatprep.subr.bf16.mxu0 %v837_v0 }
  0x4c   : > { %637 = vmatprep.subr.bf16.mxu1 %v837_v0 }
  0x4e   : > { %654 = vmatpush3.bf16.msra.mxu0 %v734_v17 }
  0x4f   : > { %638 = vmatpush3.bf16.msra.mxu1 %v728_v11  ;;  %655 = vmatprep.subr.bf16.mxu0 %v837_v0 }
  0x50   : > { %639 = vmatprep.subr.bf16.mxu1 %v837_v0 }
  0x52   : > { %656 = vmatpush3.bf16.msra.mxu0 %v735_v18 }
  0x53   : > { %640 = vmatpush3.bf16.msra.mxu1 %v729_v12  ;;  %657 = vmatprep.subr.bf16.mxu0 %v837_v0 }
  0x56   : > { %658 = vmatpush3.bf16.msra.mxu0 %v736_v33 }
  0x57   : > { %659 = vmatprep.subr.bf16.mxu0 %v837_v0 }
  0x5a   : > { %660 = vmatpush3.bf16.msra.mxu0 %v737_v34 }
 0x110   : > { %v242_v24 = vpop.f32.mrb[0].mxu0 }
 0x111   : > { %v243_v25 = vadd.f32 %v242_v24, %v197_v23  ;;  %v623_v26 = vpop.f32.mrb[1].mxu0 }
 0x112   : > { %v245_v27 = vpop.f32.mrb[2].mxu0 }
 0x113   : > { %v246_v28 = vadd.f32 %v245_v27, %v197_v23  ;;  %v624_v29 = vpop.f32.mrb[3].mxu0  ;;  %v249_v30 = vmax.f32 %v243_v25, 0.0 }
 0x115   : > { %v250_v31 = vmax.f32 %v246_v28, 0.0 }
 0x117   : > { %v251_v32 = vpack.c.bf16 %v250_v31, %v249_v30 }
 0x119   : > { %642 = vmatmul.mubr.bf16.vlgmr.msra.gmra.mrb[0].mxu1 %v251_v32 }
 0x1ec   : > { %v355_v37 = vpop.f32.mrb[0].mxu1 }
 0x1ed   : > { %v356_v38 = vadd.f32 %v355_v37, %v272_v36  ;;  %v643_v39 = vpop.f32.mrb[1].mxu1 }
 0x1ee   : > { %v358_v40 = vpop.f32.mrb[2].mxu1 }
 0x1ef   : > { %v359_v41 = vadd.f32 %v358_v40, %v272_v36  ;;  %v644_v42 = vpop.f32.mrb[3].mxu1  ;;  %v362_v43 = vmax.f32 %v356_v38, 0.0 }
 0x1f1   : > { %v363_v44 = vmax.f32 %v359_v41, 0.0 }
 0x1f3   : > { %v364_v45 = vpack.c.bf16 %v363_v44, %v362_v43 }
 0x1f5   : > { %662 = vmatmul.mubr.bf16.vlgmr.msra.gmra.mrb[4].mxu0 %v364_v45 }
 0x2c8   : > { %v468_v48 = vpop.f32.mrb[4].mxu0 }
 0x2c9   : > { %v469_v49 = vadd.f32 %v468_v48, %v385_v47  ;;  %v663_v50 = vpop.f32.mrb[5].mxu0 }
 0x2ca   : > { %v471_v51 = vpop.f32.mrb[6].mxu0 }
 0x2cb   : > { %476 = vst.msk [vmem:[%s179_s4] sm:$0xff] %vm475_vm2, %v469_v49  ;;  %v472_v52 = vadd.f32 %v471_v51, %v385_v47  ;;  %v664_v53 = vpop.f32.mrb[7].mxu0 }
 0x2cd   : > { %477 = vst.msk [vmem:[%s179_s4 + $0x8] sm:$0xff] %vm475_vm2, %v472_v52 }
 0x2ce   : > { %779 = shalt.err (!%p776_p7)
}
 0x2cf   : > { %s780_s20 = scalar_lea.hbm %s982_s9, 256  ;;  %s784_s26 = scalar_lea.hbm %s1028_s3, 512 }
 0x2d0   : > { %p781_p8 = scmp.ne.s32.totalorder %s982_s9, %s780_s20  ;;  %p785_p1 = scmp.lt.u32.totalorder %s982_s9, %s1028_s3 }
 0x2d1   : > { %p786_p0 = scmp.lt.u32.totalorder %s784_s26, %s780_s20  ;;  %p788_p6 = scmp.lt.u32.totalorder %s780_s20, %s982_s9 }
 0x2d2   : > { %p782_p11 = pnand %p781_p8, %p1039_p9 }
 0x2d3   : > { %p787_p5 = por %p786_p0, %p785_p1 }
 0x2d4   : > { %p783_p13 = pneg %p782_p11 }
 0x2d5   : > { %p789_p10 = por %p788_p6, %p787_p5 }
 0x2d7   : > { %p790_p12 = pnand %p789_p10, %p783_p13 }
 0x2d9   : > { %793 = shalt.err (!%p790_p12)
}
 0x2da   : > { %s840_s29 = smov 128   ;;  %s841_s30 = smov 8  }
 0x2db   : > { %669 = dma.vmem_to_hbm [thread:$0]  (%p1039_p9), %s977_s5, 256, %s982_s9, %s984_s16, %s840_s29, %s840_s29, %s841_s30  }
 0x2dc PF: > { %p681_p2 = scmp.ge.s32.totalorder %s832_s15, 2  ;;  %s507_s4 = sand.u32 1, %s820_s12  }
 0x2dd   : > { %p1040_p3 = scmp.ne.s32.totalorder %s1033_s23, 0  ;;  %s508_s6 = scalar_lea.sflag [#allocation4], %s507_s4 }
 0x2df   : > { %p676_p4 = pnand %p681_p2, %p1040_p3 }
 0x2e1   : > { %815 = dma.done.wait (!%p676_p4), %s508_s6, 256  }
 0x2e2   : > { %817 = vsyncadd (!%p676_p4), %s508_s6, 4294967040  ;;  %p14_p7 = scmp.ge.s32.totalorder %s887_s18, 4   ;;  %s1041_s12 = smov %s824_s13 }
 0x2e3   : > { %s1042_s13 = smov %s828_s14  ;;  %s1043_s14 = smov %s898_s21 }
 0x2e4   : > { %s1044_s15 = smov %s887_s18  ;;  %16 = sbr.rel (!%p14_p7) target bundleno = 4 (0x4), region = 74 }
 0x2eb   :  { %513 = vsyncpa [#allocation3], 1 }
 0x2ec   :  { %515 = vsyncpa [#allocation3 + $0x1], 1 }
 0x2ed   :  { %516 = vsyncpa [#allocation4], 1 }
 0x2ee   :  { %518 = vsyncpa [#allocation4 + $0x1], 1 }

</bundles_post_ra>
